<compile_context>
chip_gen: v6e
topology: v6e:2x2x1
jax: 0.10.0
libtpu: 0.0.40
codegen_flags: <defaults>
</compile_context>

<pallas_src>
import math

import jax
import jax.numpy as jnp
from jax.experimental import pallas as pl
from jax.experimental.pallas import tpu as pltpu

_MIB = 1024 * 1024


def _round_up(x, m):
    return -(-x // m) * m


def _lane_pad(n):
    return _round_up(max(int(n), 1), 128)


def _sublane_multiple(dtype):
    # Sub-32-bit dtypes pack along sublanes: bf16 tiles are (16, 128), etc.
    return 8 * max(1, 4 // jnp.dtype(dtype).itemsize)


def _vmem_capacity_bytes():
    try:
        return int(pltpu.get_tpu_info().vmem_capacity_bytes)
    except Exception:
        return 64 * _MIB  # conservative fallback (v7x-sized VMEM)


def _make_kernel(f1, with_cat):
    """Kernel body: logits = x1 @ w1 + x2 @ w2 + (b1 + b2); cat = [x1, x2]."""

    def kernel(x1_ref, x2_ref, w1_ref, w2_ref, b_ref, logits_ref, *cat_refs):
        x1 = x1_ref[...]
        x2 = x2_ref[...]
        # Two dots on the unstacked weights: no lane-misaligned concat feeds
        # the MXU, and the kernel is HBM-bound so the extra push is free.
        acc = jnp.dot(x1, w1_ref[...], preferred_element_type=jnp.float32)
        acc = acc + jnp.dot(x2, w2_ref[...], preferred_element_type=jnp.float32)
        logits_ref[...] = (acc + b_ref[...]).astype(logits_ref.dtype)
        if with_cat:
            cat_ref = cat_refs[0]
            # Two direct sub-stores into the cat tile.
            cat_ref[:, :f1] = x1.astype(cat_ref.dtype)
            cat_ref[:, f1:] = x2.astype(cat_ref.dtype)

    return kernel


def _pick_batch_tile(B, F1, F2, O, F, act_dtype, w_dtype, logits_dtype,
                     cat_dtype, budget, with_cat):
    """Largest batch tile whose (8,128)-padded, double-buffered footprint
    stays within `budget`."""
    act_sz = jnp.dtype(act_dtype).itemsize
    w_sz = jnp.dtype(w_dtype).itemsize
    log_sz = jnp.dtype(logits_dtype).itemsize
    cat_sz = jnp.dtype(cat_dtype).itemsize
    sub_act = _sublane_multiple(act_dtype)
    sub_w = _sublane_multiple(w_dtype)

    # Resident parameters (single-buffered: constant block index + Buffered(1)).
    params = (_round_up(F1, sub_w) + _round_up(F2, sub_w)) * _lane_pad(O) * w_sz
    params += 8 * _lane_pad(O) * 4  # bias row, f32

    def footprint(tb):
        tbp = _round_up(tb, sub_act)
        acts = 2 * tbp * (_lane_pad(F1) + _lane_pad(F2)) * act_sz  # dbl-buffered inputs
        outs = 2 * tbp * _lane_pad(O) * log_sz                     # dbl-buffered logits
        if with_cat:
            outs += 2 * tbp * _lane_pad(F) * cat_sz                # dbl-buffered cat
        return params + acts + outs

    if B <= 8:
        tb = B  # block == full batch dim (allowed by the (8,128) rule)
    else:
        # Upper bound: whole batch, but keep per-step streamed input bytes in
        # the multi-MiB range (long DMAs, few ~0.35us grid steps).
        per_row = (_lane_pad(F1) + _lane_pad(F2)) * act_sz
        cap_rows = max(8, (8 * _MIB) // max(per_row, 1))
        tb = min(_round_up(B, 8), _round_up(cap_rows, 8), 4096)
        while tb > 8 and footprint(tb) > budget:
            tb = max(8, _round_up(tb // 2, 8))
    # TODO(synk): if footprint(8) still exceeds the budget (huge F*O heads),
    # the weights themselves would need K/N tiling, which this kernel omits.
    return tb, footprint(tb)


def classifier_sum(x1, x2, w1, b1, w2, b2, *, with_cat=True):
    """Pallas-backed forward of ClassifierSum.

    x1: (B, F1)  x2: (B, F2)
    w1: (F1, O)  b1: (O,)     w2: (F2, O)  b2: (O,)   ((in, out) weight layout)
    Returns (logits, cat) with logits = x1@w1 + b1 + x2@w2 + b2 and
    cat = concat([x1, x2], axis=-1); returns just logits if with_cat=False.
    """
    B, F1 = x1.shape
    B2, F2 = x2.shape
    assert B == B2, "x1 / x2 batch mismatch"
    O = w1.shape[1]
    assert w1.shape == (F1, O) and w2.shape == (F2, O)
    F = F1 + F2

    logits_dtype = jnp.result_type(x1.dtype, x2.dtype, w1.dtype, w2.dtype,
                                   b1.dtype, b2.dtype)
    cat_dtype = jnp.result_type(x1.dtype, x2.dtype)
    act_dtype = x1.dtype

    # Pre-summed bias (O elements; negligible and constant-folded under jit).
    b = (b1.astype(jnp.float32) + b2.astype(jnp.float32)).reshape(1, O)

    # Generation-aware VMEM budgeting.
    capacity = _vmem_capacity_bytes()
    vmem_limit = max(16 * _MIB, min(100 * _MIB, capacity - 16 * _MIB))
    budget = int(vmem_limit * 0.85)

    TB, footprint = _pick_batch_tile(B, F1, F2, O, F, act_dtype, w1.dtype,
                                     logits_dtype, cat_dtype, budget, with_cat)
    vmem_limit = int(min(max(vmem_limit, footprint + 2 * _MIB),
                         capacity - 8 * _MIB))
    grid = (pl.cdiv(B, TB),)

    bytes_accessed = (
        x1.size * x1.dtype.itemsize + x2.size * x2.dtype.itemsize
        + w1.size * w1.dtype.itemsize + w2.size * w2.dtype.itemsize
        + b.size * b.dtype.itemsize
        + B * O * jnp.dtype(logits_dtype).itemsize
        + (B * F * jnp.dtype(cat_dtype).itemsize if with_cat else 0)
    )
    cost = pl.CostEstimate(flops=2 * B * F * O, transcendentals=0,
                           bytes_accessed=int(bytes_accessed))

    out_shape = [jax.ShapeDtypeStruct((B, O), logits_dtype)]
    out_specs = [pl.BlockSpec((TB, O), lambda i: (i, 0))]
    if with_cat:
        out_shape.append(jax.ShapeDtypeStruct((B, F), cat_dtype))
        out_specs.append(pl.BlockSpec((TB, F), lambda i: (i, 0)))

    kernel = _make_kernel(F1, with_cat)

    def build(single_buffer_params):
        # Constant block index keeps the parameters VMEM-resident across grid
        # steps; Buffered(1) avoids wasting a second buffered copy on them.
        pkw = {"pipeline_mode": pl.Buffered(1)} if single_buffer_params else {}
        in_specs = [
            pl.BlockSpec((TB, F1), lambda i: (i, 0)),          # x1: batch-streamed
            pl.BlockSpec((TB, F2), lambda i: (i, 0)),          # x2: batch-streamed
            pl.BlockSpec((F1, O), lambda i: (0, 0), **pkw),    # w1: resident
            pl.BlockSpec((F2, O), lambda i: (0, 0), **pkw),    # w2: resident
            pl.BlockSpec((1, O), lambda i: (0, 0), **pkw),     # summed bias
        ]
        grid_spec = pltpu.PrefetchScalarGridSpec(
            num_scalar_prefetch=0,
            grid=grid,
            in_specs=in_specs,
            out_specs=tuple(out_specs),
        )
        return pl.pallas_call(
            kernel,
            out_shape=tuple(out_shape),
            grid_spec=grid_spec,
            compiler_params=pltpu.CompilerParams(
                # TODO(synk): on v7x, pltpu.CORE_PARALLEL on the batch axis
                # would shard grid steps across both TensorCores; "parallel"
                # is kept as the portable default here.
                dimension_semantics=("parallel",),
                vmem_limit_bytes=vmem_limit,
            ),
            cost_estimate=cost,
        )

    try:
        out = build(True)(x1, x2, w1, w2, b)
    except Exception:
        # Fallback if this JAX build rejects single-buffered pipeline_mode.
        out = build(False)(x1, x2, w1, w2, b)

    if with_cat:
        logits, cat = out
        return logits, cat
    return out[0]


def xavier_uniform(key, fan_in, fan_out, dtype=jnp.float32):
    # Matches torch.nn.init.xavier_uniform_ for an (out, in) Linear weight;
    # generated directly in (in, out) layout (same bound, transposed storage).
    bound = math.sqrt(6.0 / (fan_in + fan_out))
    return jax.random.uniform(key, (fan_in, fan_out), dtype=dtype,
                              minval=-bound, maxval=bound)


if __name__ == "__main__":
    # Small shapes consistent with the module's forward:
    #   x1: (batch, m1_feature_size), x2: (batch, m2_feature_size)
    batch = 2
    m1_feature_size = 32
    m2_feature_size = 48
    output_size = 16

    key = jax.random.PRNGKey(0)
    k_x1, k_x2, k_w1, k_w2 = jax.random.split(key, 4)

    x1 = jax.random.normal(k_x1, (batch, m1_feature_size), dtype=jnp.float32)
    x2 = jax.random.normal(k_x2, (batch, m2_feature_size), dtype=jnp.float32)

    # Parameters: xavier_uniform weights, biases filled with 0.01 (init_weights).
    w1 = xavier_uniform(k_w1, m1_feature_size, output_size)
    b1 = jnp.full((output_size,), 0.01, dtype=jnp.float32)
    w2 = xavier_uniform(k_w2, m2_feature_size, output_size)
    b2 = jnp.full((output_size,), 0.01, dtype=jnp.float32)

    logits, cat = classifier_sum(x1, x2, w1, b1, w2, b2)
    jax.block_until_ready((logits, cat))

    # Reference check in plain JAX.
    ref_logits = x1 @ w1 + b1 + x2 @ w2 + b2
    ref_cat = jnp.concatenate([x1, x2], axis=-1)
    assert logits.shape == (batch, output_size)
    assert cat.shape == (batch, m1_feature_size + m2_feature_size)
    assert jnp.allclose(logits, ref_logits, atol=1e-5, rtol=1e-5)
    assert jnp.allclose(cat, ref_cat)

    print("KERNEL_OK")
</pallas_src>

<mosaic_0001>
module attributes {stable_mosaic.version = 11 : i64} {
  func.func @kernel(%arg0: i32, %arg1: memref<2x32xf32, #tpu.memory_space<vmem>>, %arg2: memref<2x48xf32, #tpu.memory_space<vmem>>, %arg3: memref<32x16xf32, #tpu.memory_space<vmem>>, %arg4: memref<48x16xf32, #tpu.memory_space<vmem>>, %arg5: memref<1x16xf32, #tpu.memory_space<vmem>>, %arg6: memref<2x16xf32, #tpu.memory_space<vmem>>, %arg7: memref<2x80xf32, #tpu.memory_space<vmem>>) attributes {dimension_semantics = [#tpu.dimension_semantics<parallel>], iteration_bounds = array<i64: 1>, scalar_prefetch = 0 : i64, scratch_operands = 0 : i64, tpu.core_type = #tpu.core_type<tc>, window_params = [{transform_indices = @transform_0, window_bounds = array<i64: 2, 32>}, {transform_indices = @transform_1, window_bounds = array<i64: 2, 48>}, {pipeline_mode = #tpu.pipeline_mode<synchronous>, transform_indices = @transform_2, window_bounds = array<i64: 32, 16>}, {pipeline_mode = #tpu.pipeline_mode<synchronous>, transform_indices = @transform_3, window_bounds = array<i64: 48, 16>}, {pipeline_mode = #tpu.pipeline_mode<synchronous>, transform_indices = @transform_4, window_bounds = array<i64: 1, 16>}, {transform_indices = @transform_5, window_bounds = array<i64: 2, 16>}, {transform_indices = @transform_6, window_bounds = array<i64: 2, 80>}]} {
    %c0 = arith.constant 0 : index
    %c0_0 = arith.constant 0 : index
    %0 = vector.load %arg1[%c0, %c0_0] : memref<2x32xf32, #tpu.memory_space<vmem>>, vector<2x32xf32>
    %c0_1 = arith.constant 0 : index
    %c0_2 = arith.constant 0 : index
    %1 = vector.load %arg2[%c0_1, %c0_2] : memref<2x48xf32, #tpu.memory_space<vmem>>, vector<2x48xf32>
    %c0_3 = arith.constant 0 : index
    %c0_4 = arith.constant 0 : index
    %2 = vector.load %arg3[%c0_3, %c0_4] : memref<32x16xf32, #tpu.memory_space<vmem>>, vector<32x16xf32>
    %cst = arith.constant dense<0.000000e+00> : vector<2x16xf32>
    %3 = tpu.matmul %0, %2, %cst {dimension_numbers = #tpu.dot_dimension_numbers<[1], [0], [0], [1], [0, 0, 1, 1], [], []>} : vector<2x32xf32>, vector<32x16xf32>, vector<2x16xf32> -> vector<2x16xf32>
    %c0_5 = arith.constant 0 : index
    %c0_6 = arith.constant 0 : index
    %4 = vector.load %arg4[%c0_5, %c0_6] : memref<48x16xf32, #tpu.memory_space<vmem>>, vector<48x16xf32>
    %cst_7 = arith.constant dense<0.000000e+00> : vector<2x16xf32>
    %5 = tpu.matmul %1, %4, %cst_7 {dimension_numbers = #tpu.dot_dimension_numbers<[1], [0], [0], [1], [0, 0, 1, 1], [], []>} : vector<2x48xf32>, vector<48x16xf32>, vector<2x16xf32> -> vector<2x16xf32>
    %6 = arith.addf %3, %5 : vector<2x16xf32>
    %c0_8 = arith.constant 0 : index
    %c0_9 = arith.constant 0 : index
    %7 = vector.load %arg5[%c0_8, %c0_9] : memref<1x16xf32, #tpu.memory_space<vmem>>, vector<1x16xf32>
    %8 = vector.broadcast %7 : vector<1x16xf32> to vector<2x16xf32>
    %9 = arith.addf %6, %8 : vector<2x16xf32>
    %c0_10 = arith.constant 0 : index
    %c0_11 = arith.constant 0 : index
    %10 = vector.load %arg6[%c0_10, %c0_11] : memref<2x16xf32, #tpu.memory_space<vmem>>, vector<2x16xf32>
    tpu.vector_store %arg6[%c0_10, %c0_11], %9 {strides = array<i32>} : memref<2x16xf32, #tpu.memory_space<vmem>>, vector<2x16xf32>,
    %c0_12 = arith.constant 0 : index
    %c0_13 = arith.constant 0 : index
    %11 = vector.load %arg7[%c0_12, %c0_13] : memref<2x80xf32, #tpu.memory_space<vmem>>, vector<2x32xf32>
    tpu.vector_store %arg7[%c0_12, %c0_13], %0 {strides = array<i32>} : memref<2x80xf32, #tpu.memory_space<vmem>>, vector<2x32xf32>,
    %c0_14 = arith.constant 0 : index
    %c32 = arith.constant 32 : index
    %12 = vector.load %arg7[%c0_14, %c32] : memref<2x80xf32, #tpu.memory_space<vmem>>, vector<2x48xf32>
    tpu.vector_store %arg7[%c0_14, %c32], %1 {strides = array<i32>} : memref<2x80xf32, #tpu.memory_space<vmem>>, vector<2x48xf32>,
    return
  }
  func.func @transform_0(%arg0: i32) -> (i32, i32) {
    %c0_i32 = arith.constant 0 : i32
    %c0_i32_0 = arith.constant 0 : i32
    return %arg0, %c0_i32 : i32, i32
  }
  func.func @transform_1(%arg0: i32) -> (i32, i32) {
    %c0_i32 = arith.constant 0 : i32
    %c0_i32_0 = arith.constant 0 : i32
    return %arg0, %c0_i32 : i32, i32
  }
  func.func @transform_2(%arg0: i32) -> (i32, i32) {
    %c0_i32 = arith.constant 0 : i32
    %c0_i32_0 = arith.constant 0 : i32
    %c0_i32_1 = arith.constant 0 : i32
    return %c0_i32, %c0_i32_0 : i32, i32
  }
  func.func @transform_3(%arg0: i32) -> (i32, i32) {
    %c0_i32 = arith.constant 0 : i32
    %c0_i32_0 = arith.constant 0 : i32
    %c0_i32_1 = arith.constant 0 : i32
    return %c0_i32, %c0_i32_0 : i32, i32
  }
  func.func @transform_4(%arg0: i32) -> (i32, i32) {
    %c0_i32 = arith.constant 0 : i32
    %c0_i32_0 = arith.constant 0 : i32
    %c0_i32_1 = arith.constant 0 : i32
    return %c0_i32, %c0_i32_0 : i32, i32
  }
  func.func @transform_5(%arg0: i32) -> (i32, i32) {
    %c0_i32 = arith.constant 0 : i32
    %c0_i32_0 = arith.constant 0 : i32
    return %arg0, %c0_i32 : i32, i32
  }
  func.func @transform_6(%arg0: i32) -> (i32, i32) {
    %c0_i32 = arith.constant 0 : i32
    %c0_i32_0 = arith.constant 0 : i32
    return %arg0, %c0_i32 : i32, i32
  }
}

module attributes {stable_mosaic.version = 11 : i64} {
  func.func @kernel(%arg0: i32, %arg1: memref<2x32xf32, #tpu.memory_space<vmem>>, %arg2: memref<2x48xf32, #tpu.memory_space<vmem>>, %arg3: memref<32x16xf32, #tpu.memory_space<vmem>>, %arg4: memref<48x16xf32, #tpu.memory_space<vmem>>, %arg5: memref<1x16xf32, #tpu.memory_space<vmem>>, %arg6: memref<2x16xf32, #tpu.memory_space<vmem>>, %arg7: memref<2x80xf32, #tpu.memory_space<vmem>>) attributes {dimension_semantics = [#tpu.dimension_semantics<parallel>], iteration_bounds = array<i64: 1>, scalar_prefetch = 0 : i64, scratch_operands = 0 : i64, tpu.core_type = #tpu.core_type<tc>, window_params = [{transform_indices = @transform_0, window_bounds = array<i64: 2, 32>}, {transform_indices = @transform_1, window_bounds = array<i64: 2, 48>}, {pipeline_mode = #tpu.pipeline_mode<synchronous>, transform_indices = @transform_2, window_bounds = array<i64: 32, 16>}, {pipeline_mode = #tpu.pipeline_mode<synchronous>, transform_indices = @transform_3, window_bounds = array<i64: 48, 16>}, {pipeline_mode = #tpu.pipeline_mode<synchronous>, transform_indices = @transform_4, window_bounds = array<i64: 1, 16>}, {transform_indices = @transform_5, window_bounds = array<i64: 2, 16>}, {transform_indices = @transform_6, window_bounds = array<i64: 2, 80>}]} {
    %c0 = arith.constant 0 : index
    %c0_0 = arith.constant 0 : index
    %0 = vector.load %arg1[%c0, %c0_0] : memref<2x32xf32, #tpu.memory_space<vmem>>, vector<2x32xf32>
    %c0_1 = arith.constant 0 : index
    %c0_2 = arith.constant 0 : index
    %1 = vector.load %arg2[%c0_1, %c0_2] : memref<2x48xf32, #tpu.memory_space<vmem>>, vector<2x48xf32>
    %c0_3 = arith.constant 0 : index
    %c0_4 = arith.constant 0 : index
    %2 = vector.load %arg3[%c0_3, %c0_4] : memref<32x16xf32, #tpu.memory_space<vmem>>, vector<32x16xf32>
    %cst = arith.constant dense<0.000000e+00> : vector<2x16xf32>
    %3 = tpu.matmul %0, %2, %cst {dimension_numbers = #tpu.dot_dimension_numbers<[1], [0], [0], [1], [0, 0, 1, 1], [], []>} : vector<2x32xf32>, vector<32x16xf32>, vector<2x16xf32> -> vector<2x16xf32>
    %c0_5 = arith.constant 0 : index
    %c0_6 = arith.constant 0 : index
    %4 = vector.load %arg4[%c0_5, %c0_6] : memref<48x16xf32, #tpu.memory_space<vmem>>, vector<48x16xf32>
    %cst_7 = arith.constant dense<0.000000e+00> : vector<2x16xf32>
    %5 = tpu.matmul %1, %4, %cst_7 {dimension_numbers = #tpu.dot_dimension_numbers<[1], [0], [0], [1], [0, 0, 1, 1], [], []>} : vector<2x48xf32>, vector<48x16xf32>, vector<2x16xf32> -> vector<2x16xf32>
    %6 = arith.addf %3, %5 : vector<2x16xf32>
    %c0_8 = arith.constant 0 : index
    %c0_9 = arith.constant 0 : index
    %7 = vector.load %arg5[%c0_8, %c0_9] : memref<1x16xf32, #tpu.memory_space<vmem>>, vector<1x16xf32>
    %8 = vector.broadcast %7 : vector<1x16xf32> to vector<2x16xf32>
    %9 = arith.addf %6, %8 : vector<2x16xf32>
    %c0_10 = arith.constant 0 : index
    %c0_11 = arith.constant 0 : index
    %10 = vector.load %arg6[%c0_10, %c0_11] : memref<2x16xf32, #tpu.memory_space<vmem>>, vector<2x16xf32>
    tpu.vector_store %arg6[%c0_10, %c0_11], %9 {strides = array<i32>} : memref<2x16xf32, #tpu.memory_space<vmem>>, vector<2x16xf32>,
    %c0_12 = arith.constant 0 : index
    %c0_13 = arith.constant 0 : index
    %11 = vector.load %arg7[%c0_12, %c0_13] : memref<2x80xf32, #tpu.memory_space<vmem>>, vector<2x32xf32>
    tpu.vector_store %arg7[%c0_12, %c0_13], %0 {strides = array<i32>} : memref<2x80xf32, #tpu.memory_space<vmem>>, vector<2x32xf32>,
    %c0_14 = arith.constant 0 : index
    %c32 = arith.constant 32 : index
    %12 = vector.load %arg7[%c0_14, %c32] : memref<2x80xf32, #tpu.memory_space<vmem>>, vector<2x48xf32>
    tpu.vector_store %arg7[%c0_14, %c32], %1 {strides = array<i32>} : memref<2x80xf32, #tpu.memory_space<vmem>>, vector<2x48xf32>,
    return
  }
  func.func @transform_0(%arg0: i32) -> (i32, i32) {
    %c0_i32 = arith.constant 0 : i32
    %c0_i32_0 = arith.constant 0 : i32
    return %arg0, %c0_i32 : i32, i32
  }
  func.func @transform_1(%arg0: i32) -> (i32, i32) {
    %c0_i32 = arith.constant 0 : i32
    %c0_i32_0 = arith.constant 0 : i32
    return %arg0, %c0_i32 : i32, i32
  }
  func.func @transform_2(%arg0: i32) -> (i32, i32) {
    %c0_i32 = arith.constant 0 : i32
    %c0_i32_0 = arith.constant 0 : i32
    %c0_i32_1 = arith.constant 0 : i32
    return %c0_i32, %c0_i32_0 : i32, i32
  }
  func.func @transform_3(%arg0: i32) -> (i32, i32) {
    %c0_i32 = arith.constant 0 : i32
    %c0_i32_0 = arith.constant 0 : i32
    %c0_i32_1 = arith.constant 0 : i32
    return %c0_i32, %c0_i32_0 : i32, i32
  }
  func.func @transform_4(%arg0: i32) -> (i32, i32) {
    %c0_i32 = arith.constant 0 : i32
    %c0_i32_0 = arith.constant 0 : i32
    %c0_i32_1 = arith.constant 0 : i32
    return %c0_i32, %c0_i32_0 : i32, i32
  }
  func.func @transform_5(%arg0: i32) -> (i32, i32) {
    %c0_i32 = arith.constant 0 : i32
    %c0_i32_0 = arith.constant 0 : i32
    return %arg0, %c0_i32 : i32, i32
  }
  func.func @transform_6(%arg0: i32) -> (i32, i32) {
    %c0_i32 = arith.constant 0 : i32
    %c0_i32_0 = arith.constant 0 : i32
    return %arg0, %c0_i32 : i32, i32
  }
}

</mosaic_0001>

<bundles_post_ra>
// kernel: tpu_custom_call.1
= control target key start
LH: loop header
LB: loop body
LE: loop exit
PB: predicated region body
PF: predicated region fallthrough
CT: control target
= control target key end

     0   :  { %12 = vsyncpa [#allocation3], 0  ;;  %v319_v2 = vmov 0.0   ;;  %s404_s0 = inlined_call_operand.vmem [shape: f32[2,32], index: 0, kind: input, shape index: {}]   ;;  %s405_s1 = inlined_call_operand.vmem [shape: f32[2,48], index: 1, kind: input, shape index: {}]   ;;  %s406_s2 = inlined_call_operand.vmem [shape: f32[32,16], index: 2, kind: input, shape index: {}]   ;;  %s407_s3 = inlined_call_operand.vmem [shape: f32[48,16], index: 3, kind: input, shape index: {}]   ;;  %s408_s4 = inlined_call_operand.vmem [shape: f32[1,16], index: 4, kind: input, shape index: {}]   ;;  %s409_s5 = inlined_call_operand.hbm [shape: f32[2,16], index: 5, kind: output, shape index: {0}]   ;;  %s410_s6 = inlined_call_operand.hbm [shape: f32[2,80], index: 6, kind: output, shape index: {1}]  }
   0x1   :  { %v35_v0 = vld [vmem:[%s407_s3 + $0x28] sm:$0xff]  ;;  %v29_v1 = vld [vmem:[%s406_s2 + $0x18] sm:$0xff]  ;;  %244 = vmatprep.subr.mxu0 %v319_v2  ;;  %259 = vmatprep.subr.mxu1 %v319_v2  ;;  %v34_v3 = vld [vmem:[%s407_s3 + $0x20] sm:$0xff] }
   0x2   :  { %v28_v4 = vld [vmem:[%s406_s2 + $0x10] sm:$0xff]  ;;  %245 = vmatpush3.msra.mxu0 %v35_v0  ;;  %260 = vmatpush3.msra.mxu1 %v29_v1  ;;  %v33_v5 = vld [vmem:[%s407_s3 + $0x18] sm:$0xff]  ;;  %v27_v6 = vld [vmem:[%s406_s2 + $0x8] sm:$0xff] }
   0x3   :  { %246 = vmatprep.subr.mxu0 %v319_v2  ;;  %261 = vmatprep.subr.mxu1 %v319_v2 }
   0x4   :  { %247 = vmatpush3.msra.mxu0 %v34_v3  ;;  %262 = vmatpush3.msra.mxu1 %v28_v4 }
   0x5   :  { %13 = vsyncpa [#allocation5], 0  ;;  %248 = vmatprep.subr.mxu0 %v319_v2  ;;  %263 = vmatprep.subr.mxu1 %v319_v2  ;;  %v32_v7 = vld [vmem:[%s407_s3 + $0x10] sm:$0xff]  ;;  %v26_v8 = vld [vmem:[%s406_s2] sm:$0xff]  ;;  %vm110_vm0 = vcmask 261120   ;;  %vm320_vm1 = vmmov 0  }
   0x6   :  { %249 = vmatpush3.msra.mxu0 %v33_v5  ;;  %264 = vmatpush3.msra.mxu1 %v27_v6  ;;  %v31_v9 = vld [vmem:[%s407_s3 + $0x8] sm:$0xff]  ;;  %v24_v10 = vld [vmem:[%s404_s0] sm:$0x3]  ;;  %vm36_vm2 = vcmask 392192   ;;  %s321_s0 = smov 32   ;;  %vm194_vm3 = vcmask 254976  }
   0x7   :  { %250 = vmatprep.subr.mxu0 %v319_v2  ;;  %265 = vmatprep.subr.mxu1 %v319_v2  ;;  %v30_v11 = vld [vmem:[%s407_s3] sm:$0xff]  ;;  %195 = vst.msk [vmem:[#allocation4] sm:$0x3] %vm194_vm3, %v24_v10  ;;  %s322_s20 = smov [#allocation4]   ;;  %vm199_vm4 = vcmask 648448  }
   0x8   :  { %251 = vmatpush3.msra.mxu0 %v32_v7  ;;  %266 = vmatpush3.msra.mxu1 %v26_v8  ;;  %v25_v12 = vld [vmem:[%s405_s1] sm:$0x3]  ;;  %s217_s21 = sshll.u32 %s322_s20, 4  ;;  %s218_s21 = int_to_ptr.vmem [resolvable:$true] %s217_s21 }
   0x9   :  { %252 = vmatprep.subr.mxu0 %v319_v2  ;;  %267 = vmatprep.mubr.msk.f32.mxu1 %vm320_vm1, %v319_v2  ;;  %s275_s3 = scalar_lea.vmem %s218_s21, 32  ;;  %p280_p1 = scmp.lt.s32.totalorder %s218_s21, %s218_s21 }
   0xa   :  { %253 = vmatpush3.msra.mxu0 %v31_v9  ;;  %268 = vmatmul.mubr.msk.f32.vlgmr.msra.gmra.mxu1 %vm110_vm0, %v24_v10  ;;  %p276_p0 = scmp.ne.s32.totalorder %s218_s21, %s275_s3  ;;  %p281_p2 = scmp.lt.s32.totalorder %s275_s3, %s275_s3 }
   0xb   :  { %254 = vmatprep.subr.mxu0 %v319_v2  ;;  %256 = vmatprep.mubr.msk.f32.mxu0 %vm320_vm1, %v319_v2 }
   0xc   :  { %255 = vmatpush3.msra.mxu0 %v30_v11  ;;  %196 = vrot.lane.b32.xlu0 %v25_v12, %s321_s0  ;;  %p282_p3 = por %p281_p2, %p280_p1 }
   0xd   :  { %257 = vmatmul.mubr.msk.f32.vlgmr.msra.gmra.mxu0 %vm36_vm2, %v25_v12 }
   0xe   :  { %p283_p4 = pnand %p282_p3, %p276_p0 }
  0x7e   :  { %v197_v13 = vpop.permute.xlu0 %196 }
  0x7f   :  { %200 = vst.msk [vmem:[#allocation4] sm:$0x3] %vm199_vm4, %v197_v13 }
  0x80   :  { %286 = shalt.err (!%p283_p4)
}
  0x81   :  { %220 = dma.vmem_to_hbm [thread:$0]  %s218_s21, 32, %s410_s6, [#allocation5]   ;;  %v231_v17 = vld [vmem:[%s408_s4] ss:$0 sm:$0xff]  ;;  %vm192_vm5 = vcmask 123904  }
  0x82   :  { %s323_s25 = smov [#allocation2]  }
  0x83   :  { %s207_s26 = sshll.u32 %s323_s25, 4  ;;  %s208_s26 = int_to_ptr.vmem [resolvable:$true] %s207_s26 }
  0x84   :  { %s295_s27 = scalar_lea.vmem %s208_s26, 32  ;;  %p300_p6 = scmp.lt.s32.totalorder %s208_s26, %s208_s26 }
  0x85   :  { %p296_p5 = scmp.ne.s32.totalorder %s208_s26, %s295_s27  ;;  %p301_p7 = scmp.lt.s32.totalorder %s295_s27, %s295_s27 }
  0x87   :  { %p302_p8 = por %p301_p7, %p300_p6 }
  0x89   :  { %p303_p9 = pnand %p302_p8, %p296_p5 }
  0xca   :  { %v180_v14 = vpop.f32.mrf.mxu1 }
  0xcc   :  { %v269_v15 = vpop.f32.mrf.mxu1 }
  0xcd   :  { %v106_v16 = vpop.f32.mrf.mxu0 }
  0xce   :  { %v181_v18 = vadd.f32 %v180_v14, %v106_v16 }
  0xcf   :  { %v258_v19 = vpop.f32.mrf.mxu0 }
  0xd0   :  { %v191_v20 = vadd.f32 %v231_v17, %v181_v18 }
  0xd2   :  { %193 = vst.msk [vmem:[#allocation2] sm:$0x3] %vm192_vm5, %v191_v20 }
  0xd3   :  { %306 = shalt.err (!%p303_p9)
}
  0xd4   :  { %210 = dma.vmem_to_hbm [thread:$0]  %s208_s26, 32, %s409_s5, [#allocation3]  }
  0xd5   :  { %315 = dma.done.wait [#allocation3], 32  }
  0xd6   :  { %316 = vsyncadd [#allocation3], 4294967264 }
  0xd7   :  { %317 = dma.done.wait [#allocation5], 32  }
  0xd8   :  { %318 = vsyncadd [#allocation5], 4294967264 }
  0xd9   :  { %227 = vsyncpa [#allocation3], 1 }
  0xda   :  { %228 = vsyncpa [#allocation5], 1 }

// kernel: tpu_custom_call.1
= control target key start
LH: loop header
LB: loop body
LE: loop exit
PB: predicated region body
PF: predicated region fallthrough
CT: control target
= control target key end

     0   :  { %12 = vsyncpa [#allocation3], 0  ;;  %v319_v2 = vmov 0.0   ;;  %s404_s0 = inlined_call_operand.vmem [shape: f32[2,32], index: 0, kind: input, shape index: {}]   ;;  %s405_s1 = inlined_call_operand.vmem [shape: f32[2,48], index: 1, kind: input, shape index: {}]   ;;  %s406_s2 = inlined_call_operand.vmem [shape: f32[32,16], index: 2, kind: input, shape index: {}]   ;;  %s407_s3 = inlined_call_operand.vmem [shape: f32[48,16], index: 3, kind: input, shape index: {}]   ;;  %s408_s4 = inlined_call_operand.vmem [shape: f32[1,16], index: 4, kind: input, shape index: {}]   ;;  %s409_s5 = inlined_call_operand.hbm [shape: f32[2,16], index: 5, kind: output, shape index: {0}]   ;;  %s410_s6 = inlined_call_operand.hbm [shape: f32[2,80], index: 6, kind: output, shape index: {1}]  }
   0x1   :  { %v35_v0 = vld [vmem:[%s407_s3 + $0x28] sm:$0xff]  ;;  %v29_v1 = vld [vmem:[%s406_s2 + $0x18] sm:$0xff]  ;;  %244 = vmatprep.subr.mxu0 %v319_v2  ;;  %259 = vmatprep.subr.mxu1 %v319_v2  ;;  %v34_v3 = vld [vmem:[%s407_s3 + $0x20] sm:$0xff] }
   0x2   :  { %v28_v4 = vld [vmem:[%s406_s2 + $0x10] sm:$0xff]  ;;  %245 = vmatpush3.msra.mxu0 %v35_v0  ;;  %260 = vmatpush3.msra.mxu1 %v29_v1  ;;  %v33_v5 = vld [vmem:[%s407_s3 + $0x18] sm:$0xff]  ;;  %v27_v6 = vld [vmem:[%s406_s2 + $0x8] sm:$0xff] }
   0x3   :  { %246 = vmatprep.subr.mxu0 %v319_v2  ;;  %261 = vmatprep.subr.mxu1 %v319_v2 }
   0x4   :  { %247 = vmatpush3.msra.mxu0 %v34_v3  ;;  %262 = vmatpush3.msra.mxu1 %v28_v4 }
   0x5   :  { %13 = vsyncpa [#allocation5], 0  ;;  %248 = vmatprep.subr.mxu0 %v319_v2  ;;  %263 = vmatprep.subr.mxu1 %v319_v2  ;;  %v32_v7 = vld [vmem:[%s407_s3 + $0x10] sm:$0xff]  ;;  %v26_v8 = vld [vmem:[%s406_s2] sm:$0xff]  ;;  %vm110_vm0 = vcmask 261120   ;;  %vm320_vm1 = vmmov 0  }
   0x6   :  { %249 = vmatpush3.msra.mxu0 %v33_v5  ;;  %264 = vmatpush3.msra.mxu1 %v27_v6  ;;  %v31_v9 = vld [vmem:[%s407_s3 + $0x8] sm:$0xff]  ;;  %v24_v10 = vld [vmem:[%s404_s0] sm:$0x3]  ;;  %vm36_vm2 = vcmask 392192   ;;  %s321_s0 = smov 32   ;;  %vm194_vm3 = vcmask 254976  }
   0x7   :  { %250 = vmatprep.subr.mxu0 %v319_v2  ;;  %265 = vmatprep.subr.mxu1 %v319_v2  ;;  %v30_v11 = vld [vmem:[%s407_s3] sm:$0xff]  ;;  %195 = vst.msk [vmem:[#allocation4] sm:$0x3] %vm194_vm3, %v24_v10  ;;  %s322_s20 = smov [#allocation4]   ;;  %vm199_vm4 = vcmask 648448  }
   0x8   :  { %251 = vmatpush3.msra.mxu0 %v32_v7  ;;  %266 = vmatpush3.msra.mxu1 %v26_v8  ;;  %v25_v12 = vld [vmem:[%s405_s1] sm:$0x3]  ;;  %s217_s21 = sshll.u32 %s322_s20, 4  ;;  %s218_s21 = int_to_ptr.vmem [resolvable:$true] %s217_s21 }
   0x9   :  { %252 = vmatprep.subr.mxu0 %v319_v2  ;;  %267 = vmatprep.mubr.msk.f32.mxu1 %vm320_vm1, %v319_v2  ;;  %s275_s3 = scalar_lea.vmem %s218_s21, 32  ;;  %p280_p1 = scmp.lt.s32.totalorder %s218_s21, %s218_s21 }
   0xa   :  { %253 = vmatpush3.msra.mxu0 %v31_v9  ;;  %268 = vmatmul.mubr.msk.f32.vlgmr.msra.gmra.mxu1 %vm110_vm0, %v24_v10  ;;  %p276_p0 = scmp.ne.s32.totalorder %s218_s21, %s275_s3  ;;  %p281_p2 = scmp.lt.s32.totalorder %s275_s3, %s275_s3 }
   0xb   :  { %254 = vmatprep.subr.mxu0 %v319_v2  ;;  %256 = vmatprep.mubr.msk.f32.mxu0 %vm320_vm1, %v319_v2 }
   0xc   :  { %255 = vmatpush3.msra.mxu0 %v30_v11  ;;  %196 = vrot.lane.b32.xlu0 %v25_v12, %s321_s0  ;;  %p282_p3 = por %p281_p2, %p280_p1 }
   0xd   :  { %257 = vmatmul.mubr.msk.f32.vlgmr.msra.gmra.mxu0 %vm36_vm2, %v25_v12 }
   0xe   :  { %p283_p4 = pnand %p282_p3, %p276_p0 }
  0x7e   :  { %v197_v13 = vpop.permute.xlu0 %196 }
  0x7f   :  { %200 = vst.msk [vmem:[#allocation4] sm:$0x3] %vm199_vm4, %v197_v13 }
  0x80   :  { %286 = shalt.err (!%p283_p4)
}
  0x81   :  { %220 = dma.vmem_to_hbm [thread:$0]  %s218_s21, 32, %s410_s6, [#allocation5]   ;;  %v231_v17 = vld [vmem:[%s408_s4] ss:$0 sm:$0xff]  ;;  %vm192_vm5 = vcmask 123904  }
  0x82   :  { %s323_s25 = smov [#allocation2]  }
  0x83   :  { %s207_s26 = sshll.u32 %s323_s25, 4  ;;  %s208_s26 = int_to_ptr.vmem [resolvable:$true] %s207_s26 }
  0x84   :  { %s295_s27 = scalar_lea.vmem %s208_s26, 32  ;;  %p300_p6 = scmp.lt.s32.totalorder %s208_s26, %s208_s26 }
  0x85   :  { %p296_p5 = scmp.ne.s32.totalorder %s208_s26, %s295_s27  ;;  %p301_p7 = scmp.lt.s32.totalorder %s295_s27, %s295_s27 }
  0x87   :  { %p302_p8 = por %p301_p7, %p300_p6 }
  0x89   :  { %p303_p9 = pnand %p302_p8, %p296_p5 }
  0xca   :  { %v180_v14 = vpop.f32.mrf.mxu1 }
  0xcc   :  { %v269_v15 = vpop.f32.mrf.mxu1 }
  0xcd   :  { %v106_v16 = vpop.f32.mrf.mxu0 }
  0xce   :  { %v181_v18 = vadd.f32 %v180_v14, %v106_v16 }
  0xcf   :  { %v258_v19 = vpop.f32.mrf.mxu0 }
  0xd0   :  { %v191_v20 = vadd.f32 %v231_v17, %v181_v18 }
  0xd2   :  { %193 = vst.msk [vmem:[#allocation2] sm:$0x3] %vm192_vm5, %v191_v20 }
  0xd3   :  { %306 = shalt.err (!%p303_p9)
}
  0xd4   :  { %210 = dma.vmem_to_hbm [thread:$0]  %s208_s26, 32, %s409_s5, [#allocation3]  }
  0xd5   :  { %315 = dma.done.wait [#allocation3], 32  }
  0xd6   :  { %316 = vsyncadd [#allocation3], 4294967264 }
  0xd7   :  { %317 = dma.done.wait [#allocation5], 32  }
  0xd8   :  { %318 = vsyncadd [#allocation5], 4294967264 }
  0xd9   :  { %227 = vsyncpa [#allocation3], 1 }
  0xda   :  { %228 = vsyncpa [#allocation5], 1 }

</bundles_post_ra>
